<compile_context>
chip_gen: v6e
topology: v6e:2x2x1
jax: 0.10.0
libtpu: 0.0.40
codegen_flags: <defaults>
</compile_context>

<pallas_src>
import jax
import jax.numpy as jnp
from jax.experimental import pallas as pl
from jax.experimental.pallas import tpu as pltpu

PACK = 16  # samples packed per matrix row (16 * D=32 -> 512 lanes, 16 * O=8 -> 128 lanes)


def mlp_pos_kernel(x_ref, w_ref, b_ref, o_ref):
    # y = relu(x_packed @ W_blockdiag + b_packed)
    x = x_ref[...]                       # (TR, PACK*D)   streamed per grid step
    w = w_ref[...]                       # (PACK*D, PACK*O)  VMEM-resident
    b = b_ref[...]                       # (1, PACK*O)       VMEM-resident
    y = jnp.dot(x, w, preferred_element_type=jnp.float32)       # MXU
    o_ref[...] = jnp.maximum(y + b, 0.0).astype(o_ref.dtype)    # VPU epilogue


def init_mlp_pos_params(weight, bias, pack=PACK):
    """One-time parameter prep (hoisted out of the forward hot path).

    weight: (O, D) in PyTorch nn.Linear layout; bias: (O,).
    Returns (w_blockdiag (pack*D, pack*O), bias_packed (1, pack*O)).
    """
    wt = jnp.asarray(weight, jnp.float32).T          # (D, O)
    D, O = wt.shape
    eye = jnp.eye(pack, dtype=jnp.float32)
    # w_bd[p*D + d, q*O + o] = wt[d, o] if p == q else 0
    w_bd = jnp.einsum("pq,do->pdqo", eye, wt).reshape(pack * D, pack * O)
    b_packed = jnp.tile(jnp.asarray(bias, jnp.float32), pack).reshape(1, pack * O)
    return w_bd, b_packed


def mlp_pos(x, w_blockdiag, bias_packed, *, block_rows=2048, min_grid=4):
    """Forward of MLP_pos: relu(x @ weight.T + bias), lane-dense packed layout.

    x: (B, D) float32.  w_blockdiag / bias_packed come from init_mlp_pos_params.
    Returns (B, O) float32 where O = num_soft_token + 1.
    """
    B, D = x.shape
    Dp, Op = w_blockdiag.shape           # (PACK*D, PACK*O)
    assert Dp == PACK * D
    O = Op // PACK

    # Pad batch to a multiple of PACK (zero rows; sliced off at the end).
    B_pad = ((B + PACK - 1) // PACK) * PACK
    if B_pad != B:
        x = jnp.pad(x, ((0, B_pad - B), (0, 0)))
    R = B_pad // PACK                    # packed rows
    xp = x.reshape(R, Dp)                # (R, PACK*D) lane-dense

    # Row tile: full block when tiny (full-dim blocks are always legal),
    # otherwise a multiple of 8 packed rows, capped both by block_rows
    # (VMEM budget) and so the grid has >= min_grid steps (v7x megacore).
    if R <= 8:
        tr = R
    else:
        tr = min(block_rows, R)
        cap = max(8, (pl.cdiv(R, min_grid) // 8) * 8)
        tr = min(tr, cap)
        tr = max(8, (tr // 8) * 8)
    grid = (pl.cdiv(R, tr),)

    out_packed = pl.pallas_call(
        mlp_pos_kernel,
        out_shape=jax.ShapeDtypeStruct((R, Op), jnp.float32),
        grid_spec=pltpu.PrefetchScalarGridSpec(
            num_scalar_prefetch=0,
            grid=grid,
            in_specs=[
                # x: streamed along packed-row axis, auto double-buffered.
                pl.BlockSpec((tr, Dp), lambda i: (i, 0)),
                # weight / bias: same block every step -> resident, one DMA.
                pl.BlockSpec((Dp, Op), lambda i: (0, 0)),
                pl.BlockSpec((1, Op), lambda i: (0, 0)),
            ],
            out_specs=pl.BlockSpec((tr, Op), lambda i: (i, 0)),
        ),
        compiler_params=pltpu.CompilerParams(
            # Independent batch tiles -> shard across TensorCores (2 TCs on v7x).
            dimension_semantics=("parallel",),
        ),
    )(xp, w_blockdiag, bias_packed)

    # Unpack (R, PACK*O) -> (B_pad, O) and drop padding rows.
    return out_packed.reshape(B_pad, O)[:B]


if __name__ == "__main__":
    # Module config: dim_size=32, num_soft_token=7 -> out_features = 8.
    dim_size = 32
    num_soft_token = 7
    out_features = num_soft_token + 1

    key = jax.random.PRNGKey(0)
    kx, kw, kb, kx2, kx3 = jax.random.split(key, 5)

    bound = 1.0 / (dim_size ** 0.5)
    weight = jax.random.uniform(kw, (out_features, dim_size),
                                minval=-bound, maxval=bound, dtype=jnp.float32)
    bias = jax.random.uniform(kb, (out_features,),
                              minval=-bound, maxval=bound, dtype=jnp.float32)

    # One-time parameter prep (hoisted out of the forward path).
    w_bd, b_packed = init_mlp_pos_params(weight, bias)

    # 1) Small batch, not a multiple of PACK -> exercises pad/slice path.
    batch = 8
    x = jax.random.normal(kx, (batch, dim_size), dtype=jnp.float32)
    out = jax.block_until_ready(mlp_pos(x, w_bd, b_packed))
    ref = jnp.maximum(x @ weight.T + bias, 0.0)
    assert out.shape == (batch, out_features)
    assert jnp.allclose(out, ref, atol=1e-5, rtol=1e-5)

    # 2) Larger batch -> multiple packed-row tiles, resident weights, parallel grid.
    batch2 = 256
    x2 = jax.random.normal(kx2, (batch2, dim_size), dtype=jnp.float32)
    out2 = jax.block_until_ready(mlp_pos(x2, w_bd, b_packed))
    ref2 = jnp.maximum(x2 @ weight.T + bias, 0.0)
    assert out2.shape == (batch2, out_features)
    assert jnp.allclose(out2, ref2, atol=1e-5, rtol=1e-5)

    # 3) Odd batch (padding rows + full-block grid of 1).
    batch3 = 37
    x3 = jax.random.normal(kx3, (batch3, dim_size), dtype=jnp.float32)
    out3 = jax.block_until_ready(mlp_pos(x3, w_bd, b_packed))
    ref3 = jnp.maximum(x3 @ weight.T + bias, 0.0)
    assert out3.shape == (batch3, out_features)
    assert jnp.allclose(out3, ref3, atol=1e-5, rtol=1e-5)

    print("KERNEL_OK")
</pallas_src>

<mosaic_0001>
module attributes {stable_mosaic.version = 11 : i64} {
  func.func @mlp_pos_kernel(%arg0: i32, %arg1: memref<1x512xf32, #tpu.memory_space<vmem>>, %arg2: memref<512x128xf32, #tpu.memory_space<vmem>>, %arg3: memref<1x128xf32, #tpu.memory_space<vmem>>, %arg4: memref<1x128xf32, #tpu.memory_space<vmem>>) attributes {dimension_semantics = [#tpu.dimension_semantics<parallel>], iteration_bounds = array<i64: 1>, scalar_prefetch = 0 : i64, scratch_operands = 0 : i64, tpu.core_type = #tpu.core_type<tc>, window_params = [{transform_indices = @transform_0, window_bounds = array<i64: 1, 512>}, {pipeline_mode = #tpu.pipeline_mode<synchronous>, transform_indices = @transform_1, window_bounds = array<i64: 512, 128>}, {pipeline_mode = #tpu.pipeline_mode<synchronous>, transform_indices = @transform_2, window_bounds = array<i64: 1, 128>}, {transform_indices = @transform_3, window_bounds = array<i64: 1, 128>}]} {
    %c0 = arith.constant 0 : index
    %c0_0 = arith.constant 0 : index
    %0 = vector.load %arg1[%c0, %c0_0] : memref<1x512xf32, #tpu.memory_space<vmem>>, vector<1x512xf32>
    %c0_1 = arith.constant 0 : index
    %c0_2 = arith.constant 0 : index
    %1 = vector.load %arg2[%c0_1, %c0_2] : memref<512x128xf32, #tpu.memory_space<vmem>>, vector<512x128xf32>
    %c0_3 = arith.constant 0 : index
    %c0_4 = arith.constant 0 : index
    %2 = vector.load %arg3[%c0_3, %c0_4] : memref<1x128xf32, #tpu.memory_space<vmem>>, vector<1x128xf32>
    %cst = arith.constant dense<0.000000e+00> : vector<1x128xf32>
    %3 = tpu.matmul %0, %1, %cst {dimension_numbers = #tpu.dot_dimension_numbers<[1], [0], [0], [1], [0, 0, 1, 1], [], []>} : vector<1x512xf32>, vector<512x128xf32>, vector<1x128xf32> -> vector<1x128xf32>
    %4 = arith.addf %3, %2 : vector<1x128xf32>
    %cst_5 = arith.constant 0.000000e+00 : f32
    %5 = vector.broadcast %cst_5 : f32 to vector<1x128xf32>
    %6 = arith.maximumf %4, %5 : vector<1x128xf32>
    %c0_6 = arith.constant 0 : index
    %c0_7 = arith.constant 0 : index
    %7 = vector.load %arg4[%c0_6, %c0_7] : memref<1x128xf32, #tpu.memory_space<vmem>>, vector<1x128xf32>
    tpu.vector_store %arg4[%c0_6, %c0_7], %6 {strides = array<i32>} : memref<1x128xf32, #tpu.memory_space<vmem>>, vector<1x128xf32>,
    return
  }
  func.func @transform_0(%arg0: i32) -> (i32, i32) {
    %c0_i32 = arith.constant 0 : i32
    %c0_i32_0 = arith.constant 0 : i32
    return %arg0, %c0_i32 : i32, i32
  }
  func.func @transform_1(%arg0: i32) -> (i32, i32) {
    %c0_i32 = arith.constant 0 : i32
    %c0_i32_0 = arith.constant 0 : i32
    %c0_i32_1 = arith.constant 0 : i32
    return %c0_i32, %c0_i32_0 : i32, i32
  }
  func.func @transform_2(%arg0: i32) -> (i32, i32) {
    %c0_i32 = arith.constant 0 : i32
    %c0_i32_0 = arith.constant 0 : i32
    %c0_i32_1 = arith.constant 0 : i32
    return %c0_i32, %c0_i32_0 : i32, i32
  }
  func.func @transform_3(%arg0: i32) -> (i32, i32) {
    %c0_i32 = arith.constant 0 : i32
    %c0_i32_0 = arith.constant 0 : i32
    return %arg0, %c0_i32 : i32, i32
  }
}

</mosaic_0001>

<bundles_post_ra>
// kernel: tpu_custom_call.1
= control target key start
LH: loop header
LB: loop body
LE: loop exit
PB: predicated region body
PF: predicated region fallthrough
CT: control target
= control target key end

     0   :  { %8 = vsyncpa [#allocation3], 0  ;;  %s464_s0 = inlined_call_operand.hbm [shape: f32[1,512], index: 0, kind: input, shape index: {}]   ;;  %s465_s1 = inlined_call_operand.hbm [shape: f32[512,128], index: 1, kind: input, shape index: {}]   ;;  %s466_s2 = inlined_call_operand.vmem [shape: f32[1,128], index: 2, kind: input, shape index: {}]   ;;  %s467_s3 = inlined_call_operand.hbm [shape: f32[1,128], index: 3, kind: output, shape index: {}]  }
   0x1   :  { %9 = vsyncpa [#allocation6], 0 }
   0x2   :  { %10 = vsyncpa [#allocation4], 0  ;;  %s427_s12 = smov [#allocation2]   ;;  %s428_s14 = smov [#allocation5]  }
   0x3   :  { %s17_s13 = sshll.u32 %s427_s12, 4  ;;  %s26_s15 = sshll.u32 %s428_s14, 4  ;;  %s18_s13 = int_to_ptr.vmem [resolvable:$true] %s17_s13  ;;  %s27_s15 = int_to_ptr.vmem [resolvable:$true] %s26_s15 }
   0x4   :  { %s369_s16 = scalar_lea.vmem %s18_s13, 64  ;;  %p374_p1 = scmp.lt.s32.totalorder %s18_s13, %s18_s13 }
   0x5   :  { %p370_p0 = scmp.ne.s32.totalorder %s18_s13, %s369_s16  ;;  %p375_p2 = scmp.lt.s32.totalorder %s369_s16, %s369_s16 }
   0x7   :  { %p376_p3 = por %p375_p2, %p374_p1 }
   0x9   :  { %p377_p4 = pnand %p376_p3, %p370_p0 }
   0xb   :  { %380 = shalt.err (!%p377_p4)
}
   0xc   :  { %20 = dma.hbm_to_vmem [thread:$0]  %s464_s0, 64, %s18_s13, [#allocation3]  }
   0xd   :  { %s389_s19 = scalar_lea.vmem %s27_s15, 8192  ;;  %p394_p6 = scmp.lt.s32.totalorder %s27_s15, %s27_s15 }
   0xe   :  { %p390_p5 = scmp.ne.s32.totalorder %s27_s15, %s389_s19  ;;  %p395_p7 = scmp.lt.s32.totalorder %s389_s19, %s389_s19 }
  0x10   :  { %p396_p8 = por %p395_p7, %p394_p6 }
  0x12   :  { %p397_p9 = pnand %p396_p8, %p390_p5 }
  0x14   :  { %400 = shalt.err (!%p397_p9)
}
  0x15   :  { %s429_s20 = smov 128   ;;  %s430_s21 = smov 8  }
  0x16   :  { %32 = dma.hbm_to_vmem [thread:$0]  %s465_s1, 8192, %s27_s15, [#allocation6], %s429_s20, %s429_s20, %s430_s21  }
  0x17   :  { %421 = dma.done.wait [#allocation3], 64  }
  0x18   :  { %422 = vsyncadd [#allocation3], 4294967232 }
  0x19   :  { %423 = dma.done.wait [#allocation6], 8192  }
  0x1a   :  { %424 = vsyncadd [#allocation6], 4294959104  ;;  %v73_v0 = vld [vmem:[#allocation5 + $0xf8] sm:$0xff]  ;;  %v72_v4 = vld [vmem:[#allocation5 + $0xf0] sm:$0xff]  ;;  %v108_v38 = vlaneseq  ;;  %s431_s24 = smov [#allocation7]  }
  0x1b   :  { %v105_v1 = vld [vmem:[#allocation5 + $0x1f8] sm:$0xff]  ;;  %286 = vmatprep.subr.mxu0 %v73_v0  ;;  %v104_v5 = vld [vmem:[#allocation5 + $0x1f0] sm:$0xff]  ;;  %v71_v8 = vld [vmem:[#allocation5 + $0xe8] sm:$0xff]  ;;  %s276_s25 = sshll.u32 %s431_s24, 4  ;;  %s277_s25 = int_to_ptr.vmem [resolvable:$true] %s276_s25 }
  0x1c   :  { %v57_v2 = vld [vmem:[#allocation5 + $0x78] sm:$0xff]  ;;  %321 = vmatprep.subr.mxu1 %v105_v1  ;;  %v56_v6 = vld [vmem:[#allocation5 + $0x70] sm:$0xff]  ;;  %v103_v9 = vld [vmem:[#allocation5 + $0x1e8] sm:$0xff]  ;;  %v109_v47 = vshrl.u32 %v108_v38, 7  ;;  %s401_s26 = scalar_lea.vmem %s277_s25, 16  ;;  %s405_s27 = scalar_lea.vmem %s277_s25, 32 }
  0x1d   :  { %v89_v3 = vld [vmem:[#allocation5 + $0x178] sm:$0xff]  ;;  %287 = vmatpush3.msra.mxu0 %v57_v2  ;;  %v88_v7 = vld [vmem:[#allocation5 + $0x170] sm:$0xff]  ;;  %v55_v10 = vld [vmem:[#allocation5 + $0x68] sm:$0xff]  ;;  %p402_p10 = scmp.ne.s32.totalorder %s277_s25, %s401_s26  ;;  %p406_p11 = scmp.lt.s32.totalorder %s277_s25, %s277_s25 }
  0x1e   :  { %322 = vmatpush3.msra.mxu1 %v89_v3  ;;  %288 = vmatprep.subr.mxu0 %v72_v4  ;;  %v87_v11 = vld [vmem:[#allocation5 + $0x168] sm:$0xff]  ;;  %v70_v12 = vld [vmem:[#allocation5 + $0xe0] sm:$0xff]  ;;  %v69_v16 = vld [vmem:[#allocation5 + $0xd8] sm:$0xff]  ;;  %v114_v56 = vsub.s32 1, %v109_v47  ;;  %v122_v60 = vsub.s32 3, %v109_v47  ;;  %v110_v63 = vsub.s32 0, %v109_v47  ;;  %p407_p12 = scmp.lt.s32.totalorder %s405_s27, %s401_s26 }
  0x1f   :  { %323 = vmatprep.subr.mxu1 %v104_v5  ;;  %289 = vmatpush3.msra.mxu0 %v56_v6  ;;  %v102_v13 = vld [vmem:[#allocation5 + $0x1e0] sm:$0xff]  ;;  %v101_v17 = vld [vmem:[#allocation5 + $0x1d8] sm:$0xff]  ;;  %v68_v20 = vld [vmem:[#allocation5 + $0xd0] sm:$0xff]  ;;  %v118_v0 = vsub.s32 2, %v109_v47 }
  0x20   :  { %324 = vmatpush3.msra.mxu1 %v88_v7  ;;  %290 = vmatprep.subr.mxu0 %v71_v8  ;;  %v54_v14 = vld [vmem:[#allocation5 + $0x60] sm:$0xff]  ;;  %v53_v18 = vld [vmem:[#allocation5 + $0x58] sm:$0xff]  ;;  %v100_v21 = vld [vmem:[#allocation5 + $0x1d0] sm:$0xff]  ;;  %p408_p13 = por %p407_p12, %p406_p11 }
  0x21   :  { %325 = vmatprep.subr.mxu1 %v103_v9  ;;  %v86_v15 = vld [vmem:[#allocation5 + $0x160] sm:$0xff]  ;;  %291 = vmatpush3.msra.mxu0 %v55_v10  ;;  %v85_v19 = vld [vmem:[#allocation5 + $0x158] sm:$0xff]  ;;  %v52_v22 = vld [vmem:[#allocation5 + $0x50] sm:$0xff] }
  0x22   :  { %326 = vmatpush3.msra.mxu1 %v87_v11  ;;  %292 = vmatprep.subr.mxu0 %v70_v12  ;;  %v84_v23 = vld [vmem:[#allocation5 + $0x150] sm:$0xff]  ;;  %v67_v24 = vld [vmem:[#allocation5 + $0xc8] sm:$0xff]  ;;  %v66_v28 = vld [vmem:[#allocation5 + $0xc0] sm:$0xff]  ;;  %p409_p0 = pnand %p408_p13, %p402_p10 }
  0x23   :  { %327 = vmatprep.subr.mxu1 %v102_v13  ;;  %293 = vmatpush3.msra.mxu0 %v54_v14  ;;  %v99_v25 = vld [vmem:[#allocation5 + $0x1c8] sm:$0xff]  ;;  %v98_v29 = vld [vmem:[#allocation5 + $0x1c0] sm:$0xff]  ;;  %v65_v32 = vld [vmem:[#allocation5 + $0xb8] sm:$0xff] }
  0x24   :  { %328 = vmatpush3.msra.mxu1 %v86_v15  ;;  %294 = vmatprep.subr.mxu0 %v69_v16  ;;  %v51_v26 = vld [vmem:[#allocation5 + $0x48] sm:$0xff]  ;;  %v50_v30 = vld [vmem:[#allocation5 + $0x40] sm:$0xff]  ;;  %v97_v33 = vld [vmem:[#allocation5 + $0x1b8] sm:$0xff] }
  0x25   :  { %329 = vmatprep.subr.mxu1 %v101_v17  ;;  %295 = vmatpush3.msra.mxu0 %v53_v18  ;;  %v83_v27 = vld [vmem:[#allocation5 + $0x148] sm:$0xff]  ;;  %v82_v31 = vld [vmem:[#allocation5 + $0x140] sm:$0xff]  ;;  %v49_v34 = vld [vmem:[#allocation5 + $0x38] sm:$0xff] }
  0x26   :  { %330 = vmatpush3.msra.mxu1 %v85_v19  ;;  %296 = vmatprep.subr.mxu0 %v68_v20  ;;  %v81_v35 = vld [vmem:[#allocation5 + $0x138] sm:$0xff]  ;;  %v64_v36 = vld [vmem:[#allocation5 + $0xb0] sm:$0xff]  ;;  %v63_v41 = vld [vmem:[#allocation5 + $0xa8] sm:$0xff] }
  0x27   :  { %331 = vmatprep.subr.mxu1 %v100_v21  ;;  %297 = vmatpush3.msra.mxu0 %v52_v22  ;;  %v96_v37 = vld [vmem:[#allocation5 + $0x1b0] sm:$0xff]  ;;  %v95_v42 = vld [vmem:[#allocation5 + $0x1a8] sm:$0xff]  ;;  %v62_v45 = vld [vmem:[#allocation5 + $0xa0] sm:$0xff] }
  0x28   :  { %332 = vmatpush3.msra.mxu1 %v84_v23  ;;  %298 = vmatprep.subr.mxu0 %v67_v24  ;;  %v48_v39 = vld [vmem:[#allocation5 + $0x30] sm:$0xff]  ;;  %v47_v43 = vld [vmem:[#allocation5 + $0x28] sm:$0xff]  ;;  %v94_v46 = vld [vmem:[#allocation5 + $0x1a0] sm:$0xff] }
  0x29   :  { %333 = vmatprep.subr.mxu1 %v99_v25  ;;  %299 = vmatpush3.msra.mxu0 %v51_v26  ;;  %v80_v40 = vld [vmem:[#allocation5 + $0x130] sm:$0xff]  ;;  %v79_v44 = vld [vmem:[#allocation5 + $0x128] sm:$0xff]  ;;  %v46_v48 = vld [vmem:[#allocation5 + $0x20] sm:$0xff] }
  0x2a   :  { %334 = vmatpush3.msra.mxu1 %v83_v27  ;;  %300 = vmatprep.subr.mxu0 %v66_v28  ;;  %v78_v49 = vld [vmem:[#allocation5 + $0x120] sm:$0xff]  ;;  %v61_v50 = vld [vmem:[#allocation5 + $0x98] sm:$0xff]  ;;  %v60_v54 = vld [vmem:[#allocation5 + $0x90] sm:$0xff] }
  0x2b   :  { %335 = vmatprep.subr.mxu1 %v98_v29  ;;  %301 = vmatpush3.msra.mxu0 %v50_v30  ;;  %v93_v51 = vld [vmem:[#allocation5 + $0x198] sm:$0xff]  ;;  %v92_v55 = vld [vmem:[#allocation5 + $0x190] sm:$0xff]  ;;  %v59_v61 = vld [vmem:[#allocation5 + $0x88] sm:$0xff] }
  0x2c   :  { %336 = vmatpush3.msra.mxu1 %v82_v31  ;;  %302 = vmatprep.subr.mxu0 %v65_v32  ;;  %v45_v52 = vld [vmem:[#allocation5 + $0x18] sm:$0xff]  ;;  %v44_v57 = vld [vmem:[#allocation5 + $0x10] sm:$0xff]  ;;  %v91_v62 = vld [vmem:[#allocation5 + $0x188] sm:$0xff] }
  0x2d   :  { %337 = vmatprep.subr.mxu1 %v97_v33  ;;  %303 = vmatpush3.msra.mxu0 %v49_v34  ;;  %v77_v53 = vld [vmem:[#allocation5 + $0x118] sm:$0xff]  ;;  %v76_v58 = vld [vmem:[#allocation5 + $0x110] sm:$0xff]  ;;  %v43_v1 = vld [vmem:[#allocation5 + $0x8] sm:$0xff] }
  0x2e   :  { %338 = vmatpush3.msra.mxu1 %v81_v35  ;;  %304 = vmatprep.subr.mxu0 %v64_v36  ;;  %v41_v59 = vld [vmem:[#allocation2] sm:$0xf]  ;;  %v75_v2 = vld [vmem:[#allocation5 + $0x108] sm:$0xff]  ;;  %v58_v3 = vld [vmem:[#allocation5 + $0x80] sm:$0xff] }
  0x2f   :  { %339 = vmatprep.subr.mxu1 %v96_v37  ;;  %305 = vmatpush3.msra.mxu0 %v48_v39  ;;  %v90_v4 = vld [vmem:[#allocation5 + $0x180] sm:$0xff]  ;;  %v115_v5 = vrot.slane %v41_v59, %v114_v56  ;;  %v123_v7 = vrot.slane %v41_v59, %v122_v60  ;;  %v111_v9 = vrot.slane %v41_v59, %v110_v63  ;;  %v106_v13 = vld [vmem:[%s466_s2] sm:$0x1] }
  0x30   :  { %340 = vmatpush3.msra.mxu1 %v80_v40  ;;  %306 = vmatprep.subr.mxu0 %v63_v41  ;;  %v42_v6 = vld [vmem:[#allocation5] sm:$0xff]  ;;  %v119_v10 = vrot.slane %v41_v59, %v118_v0 }
  0x31   :  { %341 = vmatprep.subr.mxu1 %v95_v42  ;;  %307 = vmatpush3.msra.mxu0 %v47_v43  ;;  %v74_v8 = vld [vmem:[#allocation5 + $0x100] sm:$0xff] }
  0x32   :  { %342 = vmatpush3.msra.mxu1 %v79_v44  ;;  %308 = vmatprep.subr.mxu0 %v62_v45 }
  0x33   :  { %343 = vmatprep.subr.mxu1 %v94_v46  ;;  %309 = vmatpush3.msra.mxu0 %v46_v48 }
  0x34   :  { %344 = vmatpush3.msra.mxu1 %v78_v49  ;;  %310 = vmatprep.subr.mxu0 %v61_v50 }
  0x35   :  { %345 = vmatprep.subr.mxu1 %v93_v51  ;;  %311 = vmatpush3.msra.mxu0 %v45_v52 }
  0x36   :  { %346 = vmatpush3.msra.mxu1 %v77_v53  ;;  %312 = vmatprep.subr.mxu0 %v60_v54 }
  0x37   :  { %347 = vmatprep.subr.mxu1 %v92_v55  ;;  %313 = vmatpush3.msra.mxu0 %v44_v57 }
  0x38   :  { %348 = vmatpush3.msra.mxu1 %v76_v58  ;;  %314 = vmatprep.subr.mxu0 %v59_v61 }
  0x39   :  { %349 = vmatprep.subr.mxu1 %v91_v62  ;;  %315 = vmatpush3.msra.mxu0 %v43_v1 }
  0x3a   :  { %350 = vmatpush3.msra.mxu1 %v75_v2  ;;  %316 = vmatprep.subr.mxu0 %v58_v3 }
  0x3b   :  { %351 = vmatprep.subr.mxu1 %v90_v4  ;;  %317 = vmatpush3.msra.mxu0 %v42_v6 }
  0x3c   :  { %192 = vmatprep.mubr.f32.mxu0 %v115_v5  ;;  %352 = vmatpush3.msra.mxu1 %v74_v8 }
  0x3d   :  { %262 = vmatprep.mubr.f32.mxu1 %v123_v7  ;;  %193 = vmatmul.mubr.f32.vlgmr.msra.gmra.mxu0 %v111_v9 }
  0x3e   :  { %263 = vmatmul.mubr.f32.vlgmr.msra.gmra.mxu1 %v119_v10 }
  0xfd   :  { %v318_v11 = vpop.f32.mrf.mxu0 }
  0xfe   :  { %v353_v12 = vpop.f32.mrf.mxu1 }
  0xff   :  { %v319_v14 = vpop.f32.mrf.mxu0 }
 0x100   :  { %v354_v15 = vpop.f32.mrf.mxu1  ;;  %v320_v16 = vadd.f32 %v319_v14, %v318_v11 }
 0x101   :  { %v355_v18 = vadd.f32 %v354_v15, %v353_v12 }
 0x102   :  { %v195_v17 = vadd.f32 %v320_v16, %v106_v13 }
 0x104   :  { %v265_v19 = vadd.f32 %v355_v18, %v195_v17 }
 0x106   :  { %v268_v20 = vmax.f32 %v265_v19, 0.0 }
 0x108   :  { %269 = vst [vmem:[#allocation7] sm:$0x1] %v268_v20 }
 0x109   :  { %412 = shalt.err (!%p409_p0)
}
 0x10a   :  { %279 = dma.vmem_to_hbm [thread:$0]  %s277_s25, 16, %s467_s3, [#allocation4]  }
 0x10b   :  { %425 = dma.done.wait [#allocation4], 16  }
 0x10c   :  { %426 = vsyncadd [#allocation4], 4294967280 }
 0x10d   :  { %283 = vsyncpa [#allocation3], 1 }
 0x10e   :  { %284 = vsyncpa [#allocation6], 1 }
 0x10f   :  { %285 = vsyncpa [#allocation4], 1 }

</bundles_post_ra>
